<compile_context>
chip_gen: v5e
topology: v5e:2x2
jax: 0.10.0
libtpu: 0.0.40
codegen_flags: <defaults>
</compile_context>

<pallas_src>
import jax
import jax.numpy as jnp
from jax.experimental import pallas as pl
from jax.experimental.pallas import tpu as pltpu


def rnn_gate_kernel(x_flat_ref,   # (B, 2S)   bf16  channel-interleaved input
                    x0_seq_ref,   # (S, B, 1) f32   channel-0, seq-major
                    wi0_ref,      # (1, 1, 3H) f32  column 0 of GRU weight_ih (r|z|n)
                    b_gi_ref,     # (1, 1, 3H) f32  b_ih + [b_hh_r, b_hh_z, 0]
                    b_ghn_ref,    # (1, H)    f32   b_hh_n (stays inside r*(.))
                    w_hhT_ref,    # (H, 3H)   bf16  GRU weight_hh transposed (r|z|n)
                    lin_wT_ref,   # (H, O)    bf16
                    w_heads_ref,  # (2S, O)   bf16  interleaved ar|gate head weights
                    b_out_ref,    # (1, O)    f32   ar_b + gate_b + lin_b
                    out_ref):     # (B, O)    f32
    H = w_hhT_ref.shape[0]
    S = x0_seq_ref.shape[0]
    B = x_flat_ref.shape[0]

    # --- fused ar + gate heads: single MXU matmul on the interleaved input ---
    heads = jnp.dot(x_flat_ref[...], w_heads_ref[...],
                    preferred_element_type=jnp.float32)            # (B, O)

    # --- hoisted GRU input projection (channel 1 is zero inside the RNN) ---
    # gi_all[s, b, :] = x0[s, b] * W_ih[:, 0] + (b_ih + [b_hh_r, b_hh_z, 0])
    gi_all = x0_seq_ref[...] * wi0_ref[...] + b_gi_ref[...]        # (S, B, 3H) f32

    w_hhT = w_hhT_ref[...]                                         # (H, 3H) bf16
    b_ghn = b_ghn_ref[...]                                         # (1, H)  f32

    # --- serial GRU recurrence, statically unrolled (S known at trace time) ---
    h = jnp.zeros((B, H), dtype=jnp.float32)
    for t in range(S):
        gh = jnp.dot(h.astype(jnp.bfloat16), w_hhT,
                     preferred_element_type=jnp.float32)           # (B, 3H)
        gi_t = gi_all[t]                                           # (B, 3H)
        rz = jax.nn.sigmoid(gi_t[:, :2 * H] + gh[:, :2 * H])       # fused r|z
        r = rz[:, :H]
        z = rz[:, H:]
        n = jnp.tanh(gi_t[:, 2 * H:] + r * (gh[:, 2 * H:] + b_ghn))
        h = n + z * (h - n)                                        # == (1-z)*n + z*h

    # --- lin head on final hidden state; single combined bias add ---
    lin = jnp.dot(h.astype(jnp.bfloat16), lin_wT_ref[...],
                  preferred_element_type=jnp.float32)              # (B, O)

    out_ref[...] = (heads + lin + b_out_ref[...]).astype(out_ref.dtype)


def rnn_gate_net(x, params):
    """Pallas forward pass of RNNGATENet.  x: (B, seq_len, 2) float32."""
    B, S, C = x.shape
    assert C == 2
    H = params["w_hh"].shape[1]
    O = params["lin_w"].shape[0]
    f32, bf16 = jnp.float32, jnp.bfloat16

    # Channel-interleaved flat view for the fused ar/gate head matmul:
    # x_flat[b, 2s + c] == x[b, s, c].
    x_flat = x.reshape(B, 2 * S).astype(bf16)
    # Channel-0 series, seq-major, for the recurrence input projection.
    x0_seq = jnp.transpose(x[:, :, 0:1], (1, 0, 2)).astype(f32)    # (S, B, 1)

    # GRU parameters (PyTorch layout: weight_ih (3H, 2), weight_hh (3H, H), r|z|n).
    wi0 = params["w_ih"][:, 0].reshape(1, 1, 3 * H).astype(f32)
    b_gi = (params["b_ih"]
            + jnp.concatenate([params["b_hh"][:2 * H], jnp.zeros((H,), f32)])
            ).reshape(1, 1, 3 * H).astype(f32)
    b_ghn = params["b_hh"][2 * H:].reshape(1, H).astype(f32)
    w_hhT = jnp.transpose(params["w_hh"]).astype(bf16)             # (H, 3H)

    # Heads: interleave ar / gate weight rows to match x_flat's layout; fold all
    # three output biases into one.
    w_heads = jnp.stack([params["ar_w"].T, params["gate_w"].T], axis=1)  # (S, 2, O)
    w_heads = w_heads.reshape(2 * S, O).astype(bf16)               # (2S, O)
    lin_wT = jnp.transpose(params["lin_w"]).astype(bf16)           # (H, O)
    b_out = (params["ar_b"] + params["gate_b"] + params["lin_b"]
             ).reshape(1, O).astype(f32)

    args = (x_flat, x0_seq, wi0, b_gi, b_ghn, w_hhT, lin_wT, w_heads, b_out)

    return pl.pallas_call(
        rnn_gate_kernel,
        out_shape=jax.ShapeDtypeStruct((B, O), jnp.float32),
        in_specs=[pl.BlockSpec(memory_space=pltpu.MemorySpace.VMEM)] * len(args),
        out_specs=pl.BlockSpec(memory_space=pltpu.MemorySpace.VMEM),
    )(*args)


def init_params(key, seq_len, hid_dim, output_dim):
    """Deterministic synthetic parameters matching the PyTorch module's shapes."""
    ks = jax.random.split(key, 10)
    scale = 0.1
    return {
        # nn.GRU(2, hid_dim): weight_ih (3H, 2), weight_hh (3H, H), biases (3H,)
        "w_ih": scale * jax.random.normal(ks[0], (3 * hid_dim, 2), jnp.float32),
        "w_hh": scale * jax.random.normal(ks[1], (3 * hid_dim, hid_dim), jnp.float32),
        "b_ih": scale * jax.random.normal(ks[2], (3 * hid_dim,), jnp.float32),
        "b_hh": scale * jax.random.normal(ks[3], (3 * hid_dim,), jnp.float32),
        # nn.Linear(hid_dim, output_dim)
        "lin_w": scale * jax.random.normal(ks[4], (output_dim, hid_dim), jnp.float32),
        "lin_b": scale * jax.random.normal(ks[5], (output_dim,), jnp.float32),
        # nn.Linear(seq_len, output_dim)  (ar head)
        "ar_w": scale * jax.random.normal(ks[6], (output_dim, seq_len), jnp.float32),
        "ar_b": scale * jax.random.normal(ks[7], (output_dim,), jnp.float32),
        # nn.Linear(seq_len, output_dim)  (gate head)
        "gate_w": scale * jax.random.normal(ks[8], (output_dim, seq_len), jnp.float32),
        "gate_b": scale * jax.random.normal(ks[9], (output_dim,), jnp.float32),
    }


def reference_forward(x, params):
    """Pure-JAX f32 reference mirroring the PyTorch forward exactly."""
    B, S, _ = x.shape
    H = params["w_hh"].shape[1]

    gate = x[:, :, 1] @ params["gate_w"].T + params["gate_b"]
    inputs = x.at[:, :, 1].set(0.0)

    w_ih, w_hh = params["w_ih"], params["w_hh"]
    b_ih, b_hh = params["b_ih"], params["b_hh"]

    def step(h, x_t):
        gi = x_t @ w_ih.T + b_ih
        gh = h @ w_hh.T + b_hh
        r = jax.nn.sigmoid(gi[:, :H] + gh[:, :H])
        z = jax.nn.sigmoid(gi[:, H:2 * H] + gh[:, H:2 * H])
        n = jnp.tanh(gi[:, 2 * H:] + r * gh[:, 2 * H:])
        return (1.0 - z) * n + z * h, None

    h0 = jnp.zeros((B, H), jnp.float32)
    hT, _ = jax.lax.scan(step, h0, jnp.transpose(inputs, (1, 0, 2)))

    out = hT @ params["lin_w"].T + params["lin_b"]
    ar = inputs[:, :, 0] @ params["ar_w"].T + params["ar_b"]
    return out + ar + gate


if __name__ == "__main__":
    B, SEQ_LEN, HID_DIM, OUT_DIM = 2, 8, 32, 4

    key = jax.random.PRNGKey(0)
    kx, kp = jax.random.split(key)
    x = jax.random.normal(kx, (B, SEQ_LEN, 2), jnp.float32)
    params = init_params(kp, SEQ_LEN, HID_DIM, OUT_DIM)

    out = jax.block_until_ready(rnn_gate_net(x, params))
    ref = jax.block_until_ready(reference_forward(x, params))

    assert out.shape == (B, OUT_DIM)
    # bf16 MXU operands (f32 accumulation) -> relaxed tolerance vs. the f32 reference.
    assert jnp.allclose(out, ref, atol=3e-2, rtol=3e-2), (
        out, ref, jnp.max(jnp.abs(out - ref)))
    print("KERNEL_OK")
</pallas_src>

<mosaic_0001>
module attributes {stable_mosaic.version = 11 : i64} {
  func.func @rnn_gate_kernel(%arg0: memref<2x16xbf16, #tpu.memory_space<vmem>>, %arg1: memref<8x2x1xf32, #tpu.memory_space<vmem>>, %arg2: memref<1x1x96xf32, #tpu.memory_space<vmem>>, %arg3: memref<1x1x96xf32, #tpu.memory_space<vmem>>, %arg4: memref<1x32xf32, #tpu.memory_space<vmem>>, %arg5: memref<32x96xbf16, #tpu.memory_space<vmem>>, %arg6: memref<32x4xbf16, #tpu.memory_space<vmem>>, %arg7: memref<16x4xbf16, #tpu.memory_space<vmem>>, %arg8: memref<1x4xf32, #tpu.memory_space<vmem>>, %arg9: memref<2x4xf32, #tpu.memory_space<vmem>>) attributes {dimension_semantics = [], scalar_prefetch = 0 : i64, scratch_operands = 0 : i64, tpu.core_type = #tpu.core_type<tc>} {
    %c0 = arith.constant 0 : index
    %c0_0 = arith.constant 0 : index
    %0 = vector.load %arg0[%c0, %c0_0] : memref<2x16xbf16, #tpu.memory_space<vmem>>, vector<2x16xbf16>
    %c0_1 = arith.constant 0 : index
    %c0_2 = arith.constant 0 : index
    %1 = vector.load %arg7[%c0_1, %c0_2] : memref<16x4xbf16, #tpu.memory_space<vmem>>, vector<16x4xbf16>
    %cst = arith.constant dense<0.000000e+00> : vector<2x4xf32>
    %2 = tpu.matmul %0, %1, %cst {dimension_numbers = #tpu.dot_dimension_numbers<[1], [0], [0], [1], [0, 0, 1, 1], [], []>} : vector<2x16xbf16>, vector<16x4xbf16>, vector<2x4xf32> -> vector<2x4xf32>
    %c0_3 = arith.constant 0 : index
    %c0_4 = arith.constant 0 : index
    %c0_5 = arith.constant 0 : index
    %3 = vector.load %arg1[%c0_3, %c0_4, %c0_5] : memref<8x2x1xf32, #tpu.memory_space<vmem>>, vector<8x2x1xf32>
    %c0_6 = arith.constant 0 : index
    %c0_7 = arith.constant 0 : index
    %c0_8 = arith.constant 0 : index
    %4 = vector.load %arg2[%c0_6, %c0_7, %c0_8] : memref<1x1x96xf32, #tpu.memory_space<vmem>>, vector<1x1x96xf32>
    %5 = vector.broadcast %3 : vector<8x2x1xf32> to vector<8x2x96xf32>
    %6 = vector.broadcast %4 : vector<1x1x96xf32> to vector<8x2x96xf32>
    %7 = arith.mulf %5, %6 : vector<8x2x96xf32>
    %c0_9 = arith.constant 0 : index
    %c0_10 = arith.constant 0 : index
    %c0_11 = arith.constant 0 : index
    %8 = vector.load %arg3[%c0_9, %c0_10, %c0_11] : memref<1x1x96xf32, #tpu.memory_space<vmem>>, vector<1x1x96xf32>
    %9 = vector.broadcast %8 : vector<1x1x96xf32> to vector<8x2x96xf32>
    %10 = arith.addf %7, %9 : vector<8x2x96xf32>
    %c0_12 = arith.constant 0 : index
    %c0_13 = arith.constant 0 : index
    %11 = vector.load %arg5[%c0_12, %c0_13] : memref<32x96xbf16, #tpu.memory_space<vmem>>, vector<32x96xbf16>
    %c0_14 = arith.constant 0 : index
    %c0_15 = arith.constant 0 : index
    %12 = vector.load %arg4[%c0_14, %c0_15] : memref<1x32xf32, #tpu.memory_space<vmem>>, vector<1x32xf32>
    %cst_16 = arith.constant 0.000000e+00 : f32
    %13 = vector.broadcast %cst_16 : f32 to vector<2x32xf32>
    %14 = arith.truncf %13 : vector<2x32xf32> to vector<2x32xbf16>
    %cst_17 = arith.constant dense<0.000000e+00> : vector<2x96xf32>
    %15 = tpu.matmul %14, %11, %cst_17 {dimension_numbers = #tpu.dot_dimension_numbers<[1], [0], [0], [1], [0, 0, 1, 1], [], []>} : vector<2x32xbf16>, vector<32x96xbf16>, vector<2x96xf32> -> vector<2x96xf32>
    %16 = vector.extract_strided_slice %10 {offsets = [0, 0, 0], sizes = [1, 2, 96], strides = [1, 1, 1]} : vector<8x2x96xf32> to vector<1x2x96xf32>
    %17 = vector.shape_cast %16 : vector<1x2x96xf32> to vector<2x96xf32>
    %18 = vector.extract_strided_slice %17 {offsets = [0, 0], sizes = [2, 64], strides = [1, 1]} : vector<2x96xf32> to vector<2x64xf32>
    %19 = vector.extract_strided_slice %15 {offsets = [0, 0], sizes = [2, 64], strides = [1, 1]} : vector<2x96xf32> to vector<2x64xf32>
    %20 = arith.addf %18, %19 : vector<2x64xf32>
    %21 = arith.negf %20 : vector<2x64xf32>
    %22 = math.exp %21 : vector<2x64xf32>
    %cst_18 = arith.constant 1.000000e+00 : f32
    %23 = vector.broadcast %cst_18 : f32 to vector<2x64xf32>
    %24 = arith.addf %23, %22 : vector<2x64xf32>
    %25 = arith.divf %23, %24 : vector<2x64xf32>
    %26 = vector.extract_strided_slice %25 {offsets = [0, 0], sizes = [2, 32], strides = [1, 1]} : vector<2x64xf32> to vector<2x32xf32>
    %27 = vector.extract_strided_slice %25 {offsets = [0, 32], sizes = [2, 32], strides = [1, 1]} : vector<2x64xf32> to vector<2x32xf32>
    %28 = vector.extract_strided_slice %17 {offsets = [0, 64], sizes = [2, 32], strides = [1, 1]} : vector<2x96xf32> to vector<2x32xf32>
    %29 = vector.extract_strided_slice %15 {offsets = [0, 64], sizes = [2, 32], strides = [1, 1]} : vector<2x96xf32> to vector<2x32xf32>
    %30 = vector.broadcast %12 : vector<1x32xf32> to vector<2x32xf32>
    %31 = arith.addf %29, %30 : vector<2x32xf32>
    %32 = arith.mulf %26, %31 : vector<2x32xf32>
    %33 = arith.addf %28, %32 : vector<2x32xf32>
    %34 = math.tanh %33 : vector<2x32xf32>
    %35 = arith.subf %13, %34 : vector<2x32xf32>
    %36 = arith.mulf %27, %35 : vector<2x32xf32>
    %37 = arith.addf %34, %36 : vector<2x32xf32>
    %38 = arith.truncf %37 : vector<2x32xf32> to vector<2x32xbf16>
    %cst_19 = arith.constant dense<0.000000e+00> : vector<2x96xf32>
    %39 = tpu.matmul %38, %11, %cst_19 {dimension_numbers = #tpu.dot_dimension_numbers<[1], [0], [0], [1], [0, 0, 1, 1], [], []>} : vector<2x32xbf16>, vector<32x96xbf16>, vector<2x96xf32> -> vector<2x96xf32>
    %40 = vector.extract_strided_slice %10 {offsets = [1, 0, 0], sizes = [1, 2, 96], strides = [1, 1, 1]} : vector<8x2x96xf32> to vector<1x2x96xf32>
    %41 = vector.shape_cast %40 : vector<1x2x96xf32> to vector<2x96xf32>
    %42 = vector.extract_strided_slice %41 {offsets = [0, 0], sizes = [2, 64], strides = [1, 1]} : vector<2x96xf32> to vector<2x64xf32>
    %43 = vector.extract_strided_slice %39 {offsets = [0, 0], sizes = [2, 64], strides = [1, 1]} : vector<2x96xf32> to vector<2x64xf32>
    %44 = arith.addf %42, %43 : vector<2x64xf32>
    %45 = arith.negf %44 : vector<2x64xf32>
    %46 = math.exp %45 : vector<2x64xf32>
    %cst_20 = arith.constant 1.000000e+00 : f32
    %47 = vector.broadcast %cst_20 : f32 to vector<2x64xf32>
    %48 = arith.addf %47, %46 : vector<2x64xf32>
    %49 = arith.divf %47, %48 : vector<2x64xf32>
    %50 = vector.extract_strided_slice %49 {offsets = [0, 0], sizes = [2, 32], strides = [1, 1]} : vector<2x64xf32> to vector<2x32xf32>
    %51 = vector.extract_strided_slice %49 {offsets = [0, 32], sizes = [2, 32], strides = [1, 1]} : vector<2x64xf32> to vector<2x32xf32>
    %52 = vector.extract_strided_slice %41 {offsets = [0, 64], sizes = [2, 32], strides = [1, 1]} : vector<2x96xf32> to vector<2x32xf32>
    %53 = vector.extract_strided_slice %39 {offsets = [0, 64], sizes = [2, 32], strides = [1, 1]} : vector<2x96xf32> to vector<2x32xf32>
    %54 = vector.broadcast %12 : vector<1x32xf32> to vector<2x32xf32>
    %55 = arith.addf %53, %54 : vector<2x32xf32>
    %56 = arith.mulf %50, %55 : vector<2x32xf32>
    %57 = arith.addf %52, %56 : vector<2x32xf32>
    %58 = math.tanh %57 : vector<2x32xf32>
    %59 = arith.subf %37, %58 : vector<2x32xf32>
    %60 = arith.mulf %51, %59 : vector<2x32xf32>
    %61 = arith.addf %58, %60 : vector<2x32xf32>
    %62 = arith.truncf %61 : vector<2x32xf32> to vector<2x32xbf16>
    %cst_21 = arith.constant dense<0.000000e+00> : vector<2x96xf32>
    %63 = tpu.matmul %62, %11, %cst_21 {dimension_numbers = #tpu.dot_dimension_numbers<[1], [0], [0], [1], [0, 0, 1, 1], [], []>} : vector<2x32xbf16>, vector<32x96xbf16>, vector<2x96xf32> -> vector<2x96xf32>
    %64 = vector.extract_strided_slice %10 {offsets = [2, 0, 0], sizes = [1, 2, 96], strides = [1, 1, 1]} : vector<8x2x96xf32> to vector<1x2x96xf32>
    %65 = vector.shape_cast %64 : vector<1x2x96xf32> to vector<2x96xf32>
    %66 = vector.extract_strided_slice %65 {offsets = [0, 0], sizes = [2, 64], strides = [1, 1]} : vector<2x96xf32> to vector<2x64xf32>
    %67 = vector.extract_strided_slice %63 {offsets = [0, 0], sizes = [2, 64], strides = [1, 1]} : vector<2x96xf32> to vector<2x64xf32>
    %68 = arith.addf %66, %67 : vector<2x64xf32>
    %69 = arith.negf %68 : vector<2x64xf32>
    %70 = math.exp %69 : vector<2x64xf32>
    %cst_22 = arith.constant 1.000000e+00 : f32
    %71 = vector.broadcast %cst_22 : f32 to vector<2x64xf32>
    %72 = arith.addf %71, %70 : vector<2x64xf32>
    %73 = arith.divf %71, %72 : vector<2x64xf32>
    %74 = vector.extract_strided_slice %73 {offsets = [0, 0], sizes = [2, 32], strides = [1, 1]} : vector<2x64xf32> to vector<2x32xf32>
    %75 = vector.extract_strided_slice %73 {offsets = [0, 32], sizes = [2, 32], strides = [1, 1]} : vector<2x64xf32> to vector<2x32xf32>
    %76 = vector.extract_strided_slice %65 {offsets = [0, 64], sizes = [2, 32], strides = [1, 1]} : vector<2x96xf32> to vector<2x32xf32>
    %77 = vector.extract_strided_slice %63 {offsets = [0, 64], sizes = [2, 32], strides = [1, 1]} : vector<2x96xf32> to vector<2x32xf32>
    %78 = vector.broadcast %12 : vector<1x32xf32> to vector<2x32xf32>
    %79 = arith.addf %77, %78 : vector<2x32xf32>
    %80 = arith.mulf %74, %79 : vector<2x32xf32>
    %81 = arith.addf %76, %80 : vector<2x32xf32>
    %82 = math.tanh %81 : vector<2x32xf32>
    %83 = arith.subf %61, %82 : vector<2x32xf32>
    %84 = arith.mulf %75, %83 : vector<2x32xf32>
    %85 = arith.addf %82, %84 : vector<2x32xf32>
    %86 = arith.truncf %85 : vector<2x32xf32> to vector<2x32xbf16>
    %cst_23 = arith.constant dense<0.000000e+00> : vector<2x96xf32>
    %87 = tpu.matmul %86, %11, %cst_23 {dimension_numbers = #tpu.dot_dimension_numbers<[1], [0], [0], [1], [0, 0, 1, 1], [], []>} : vector<2x32xbf16>, vector<32x96xbf16>, vector<2x96xf32> -> vector<2x96xf32>
    %88 = vector.extract_strided_slice %10 {offsets = [3, 0, 0], sizes = [1, 2, 96], strides = [1, 1, 1]} : vector<8x2x96xf32> to vector<1x2x96xf32>
    %89 = vector.shape_cast %88 : vector<1x2x96xf32> to vector<2x96xf32>
    %90 = vector.extract_strided_slice %89 {offsets = [0, 0], sizes = [2, 64], strides = [1, 1]} : vector<2x96xf32> to vector<2x64xf32>
    %91 = vector.extract_strided_slice %87 {offsets = [0, 0], sizes = [2, 64], strides = [1, 1]} : vector<2x96xf32> to vector<2x64xf32>
    %92 = arith.addf %90, %91 : vector<2x64xf32>
    %93 = arith.negf %92 : vector<2x64xf32>
    %94 = math.exp %93 : vector<2x64xf32>
    %cst_24 = arith.constant 1.000000e+00 : f32
    %95 = vector.broadcast %cst_24 : f32 to vector<2x64xf32>
    %96 = arith.addf %95, %94 : vector<2x64xf32>
    %97 = arith.divf %95, %96 : vector<2x64xf32>
    %98 = vector.extract_strided_slice %97 {offsets = [0, 0], sizes = [2, 32], strides = [1, 1]} : vector<2x64xf32> to vector<2x32xf32>
    %99 = vector.extract_strided_slice %97 {offsets = [0, 32], sizes = [2, 32], strides = [1, 1]} : vector<2x64xf32> to vector<2x32xf32>
    %100 = vector.extract_strided_slice %89 {offsets = [0, 64], sizes = [2, 32], strides = [1, 1]} : vector<2x96xf32> to vector<2x32xf32>
    %101 = vector.extract_strided_slice %87 {offsets = [0, 64], sizes = [2, 32], strides = [1, 1]} : vector<2x96xf32> to vector<2x32xf32>
    %102 = vector.broadcast %12 : vector<1x32xf32> to vector<2x32xf32>
    %103 = arith.addf %101, %102 : vector<2x32xf32>
    %104 = arith.mulf %98, %103 : vector<2x32xf32>
    %105 = arith.addf %100, %104 : vector<2x32xf32>
    %106 = math.tanh %105 : vector<2x32xf32>
    %107 = arith.subf %85, %106 : vector<2x32xf32>
    %108 = arith.mulf %99, %107 : vector<2x32xf32>
    %109 = arith.addf %106, %108 : vector<2x32xf32>
    %110 = arith.truncf %109 : vector<2x32xf32> to vector<2x32xbf16>
    %cst_25 = arith.constant dense<0.000000e+00> : vector<2x96xf32>
    %111 = tpu.matmul %110, %11, %cst_25 {dimension_numbers = #tpu.dot_dimension_numbers<[1], [0], [0], [1], [0, 0, 1, 1], [], []>} : vector<2x32xbf16>, vector<32x96xbf16>, vector<2x96xf32> -> vector<2x96xf32>
    %112 = vector.extract_strided_slice %10 {offsets = [4, 0, 0], sizes = [1, 2, 96], strides = [1, 1, 1]} : vector<8x2x96xf32> to vector<1x2x96xf32>
    %113 = vector.shape_cast %112 : vector<1x2x96xf32> to vector<2x96xf32>
    %114 = vector.extract_strided_slice %113 {offsets = [0, 0], sizes = [2, 64], strides = [1, 1]} : vector<2x96xf32> to vector<2x64xf32>
    %115 = vector.extract_strided_slice %111 {offsets = [0, 0], sizes = [2, 64], strides = [1, 1]} : vector<2x96xf32> to vector<2x64xf32>
    %116 = arith.addf %114, %115 : vector<2x64xf32>
    %117 = arith.negf %116 : vector<2x64xf32>
    %118 = math.exp %117 : vector<2x64xf32>
    %cst_26 = arith.constant 1.000000e+00 : f32
    %119 = vector.broadcast %cst_26 : f32 to vector<2x64xf32>
    %120 = arith.addf %119, %118 : vector<2x64xf32>
    %121 = arith.divf %119, %120 : vector<2x64xf32>
    %122 = vector.extract_strided_slice %121 {offsets = [0, 0], sizes = [2, 32], strides = [1, 1]} : vector<2x64xf32> to vector<2x32xf32>
    %123 = vector.extract_strided_slice %121 {offsets = [0, 32], sizes = [2, 32], strides = [1, 1]} : vector<2x64xf32> to vector<2x32xf32>
    %124 = vector.extract_strided_slice %113 {offsets = [0, 64], sizes = [2, 32], strides = [1, 1]} : vector<2x96xf32> to vector<2x32xf32>
    %125 = vector.extract_strided_slice %111 {offsets = [0, 64], sizes = [2, 32], strides = [1, 1]} : vector<2x96xf32> to vector<2x32xf32>
    %126 = vector.broadcast %12 : vector<1x32xf32> to vector<2x32xf32>
    %127 = arith.addf %125, %126 : vector<2x32xf32>
    %128 = arith.mulf %122, %127 : vector<2x32xf32>
    %129 = arith.addf %124, %128 : vector<2x32xf32>
    %130 = math.tanh %129 : vector<2x32xf32>
    %131 = arith.subf %109, %130 : vector<2x32xf32>
    %132 = arith.mulf %123, %131 : vector<2x32xf32>
    %133 = arith.addf %130, %132 : vector<2x32xf32>
    %134 = arith.truncf %133 : vector<2x32xf32> to vector<2x32xbf16>
    %cst_27 = arith.constant dense<0.000000e+00> : vector<2x96xf32>
    %135 = tpu.matmul %134, %11, %cst_27 {dimension_numbers = #tpu.dot_dimension_numbers<[1], [0], [0], [1], [0, 0, 1, 1], [], []>} : vector<2x32xbf16>, vector<32x96xbf16>, vector<2x96xf32> -> vector<2x96xf32>
    %136 = vector.extract_strided_slice %10 {offsets = [5, 0, 0], sizes = [1, 2, 96], strides = [1, 1, 1]} : vector<8x2x96xf32> to vector<1x2x96xf32>
    %137 = vector.shape_cast %136 : vector<1x2x96xf32> to vector<2x96xf32>
    %138 = vector.extract_strided_slice %137 {offsets = [0, 0], sizes = [2, 64], strides = [1, 1]} : vector<2x96xf32> to vector<2x64xf32>
    %139 = vector.extract_strided_slice %135 {offsets = [0, 0], sizes = [2, 64], strides = [1, 1]} : vector<2x96xf32> to vector<2x64xf32>
    %140 = arith.addf %138, %139 : vector<2x64xf32>
    %141 = arith.negf %140 : vector<2x64xf32>
    %142 = math.exp %141 : vector<2x64xf32>
    %cst_28 = arith.constant 1.000000e+00 : f32
    %143 = vector.broadcast %cst_28 : f32 to vector<2x64xf32>
    %144 = arith.addf %143, %142 : vector<2x64xf32>
    %145 = arith.divf %143, %144 : vector<2x64xf32>
    %146 = vector.extract_strided_slice %145 {offsets = [0, 0], sizes = [2, 32], strides = [1, 1]} : vector<2x64xf32> to vector<2x32xf32>
    %147 = vector.extract_strided_slice %145 {offsets = [0, 32], sizes = [2, 32], strides = [1, 1]} : vector<2x64xf32> to vector<2x32xf32>
    %148 = vector.extract_strided_slice %137 {offsets = [0, 64], sizes = [2, 32], strides = [1, 1]} : vector<2x96xf32> to vector<2x32xf32>
    %149 = vector.extract_strided_slice %135 {offsets = [0, 64], sizes = [2, 32], strides = [1, 1]} : vector<2x96xf32> to vector<2x32xf32>
    %150 = vector.broadcast %12 : vector<1x32xf32> to vector<2x32xf32>
    %151 = arith.addf %149, %150 : vector<2x32xf32>
    %152 = arith.mulf %146, %151 : vector<2x32xf32>
    %153 = arith.addf %148, %152 : vector<2x32xf32>
    %154 = math.tanh %153 : vector<2x32xf32>
    %155 = arith.subf %133, %154 : vector<2x32xf32>
    %156 = arith.mulf %147, %155 : vector<2x32xf32>
    %157 = arith.addf %154, %156 : vector<2x32xf32>
    %158 = arith.truncf %157 : vector<2x32xf32> to vector<2x32xbf16>
    %cst_29 = arith.constant dense<0.000000e+00> : vector<2x96xf32>
    %159 = tpu.matmul %158, %11, %cst_29 {dimension_numbers = #tpu.dot_dimension_numbers<[1], [0], [0], [1], [0, 0, 1, 1], [], []>} : vector<2x32xbf16>, vector<32x96xbf16>, vector<2x96xf32> -> vector<2x96xf32>
    %160 = vector.extract_strided_slice %10 {offsets = [6, 0, 0], sizes = [1, 2, 96], strides = [1, 1, 1]} : vector<8x2x96xf32> to vector<1x2x96xf32>
    %161 = vector.shape_cast %160 : vector<1x2x96xf32> to vector<2x96xf32>
    %162 = vector.extract_strided_slice %161 {offsets = [0, 0], sizes = [2, 64], strides = [1, 1]} : vector<2x96xf32> to vector<2x64xf32>
    %163 = vector.extract_strided_slice %159 {offsets = [0, 0], sizes = [2, 64], strides = [1, 1]} : vector<2x96xf32> to vector<2x64xf32>
    %164 = arith.addf %162, %163 : vector<2x64xf32>
    %165 = arith.negf %164 : vector<2x64xf32>
    %166 = math.exp %165 : vector<2x64xf32>
    %cst_30 = arith.constant 1.000000e+00 : f32
    %167 = vector.broadcast %cst_30 : f32 to vector<2x64xf32>
    %168 = arith.addf %167, %166 : vector<2x64xf32>
    %169 = arith.divf %167, %168 : vector<2x64xf32>
    %170 = vector.extract_strided_slice %169 {offsets = [0, 0], sizes = [2, 32], strides = [1, 1]} : vector<2x64xf32> to vector<2x32xf32>
    %171 = vector.extract_strided_slice %169 {offsets = [0, 32], sizes = [2, 32], strides = [1, 1]} : vector<2x64xf32> to vector<2x32xf32>
    %172 = vector.extract_strided_slice %161 {offsets = [0, 64], sizes = [2, 32], strides = [1, 1]} : vector<2x96xf32> to vector<2x32xf32>
    %173 = vector.extract_strided_slice %159 {offsets = [0, 64], sizes = [2, 32], strides = [1, 1]} : vector<2x96xf32> to vector<2x32xf32>
    %174 = vector.broadcast %12 : vector<1x32xf32> to vector<2x32xf32>
    %175 = arith.addf %173, %174 : vector<2x32xf32>
    %176 = arith.mulf %170, %175 : vector<2x32xf32>
    %177 = arith.addf %172, %176 : vector<2x32xf32>
    %178 = math.tanh %177 : vector<2x32xf32>
    %179 = arith.subf %157, %178 : vector<2x32xf32>
    %180 = arith.mulf %171, %179 : vector<2x32xf32>
    %181 = arith.addf %178, %180 : vector<2x32xf32>
    %182 = arith.truncf %181 : vector<2x32xf32> to vector<2x32xbf16>
    %cst_31 = arith.constant dense<0.000000e+00> : vector<2x96xf32>
    %183 = tpu.matmul %182, %11, %cst_31 {dimension_numbers = #tpu.dot_dimension_numbers<[1], [0], [0], [1], [0, 0, 1, 1], [], []>} : vector<2x32xbf16>, vector<32x96xbf16>, vector<2x96xf32> -> vector<2x96xf32>
    %184 = vector.extract_strided_slice %10 {offsets = [7, 0, 0], sizes = [1, 2, 96], strides = [1, 1, 1]} : vector<8x2x96xf32> to vector<1x2x96xf32>
    %185 = vector.shape_cast %184 : vector<1x2x96xf32> to vector<2x96xf32>
    %186 = vector.extract_strided_slice %185 {offsets = [0, 0], sizes = [2, 64], strides = [1, 1]} : vector<2x96xf32> to vector<2x64xf32>
    %187 = vector.extract_strided_slice %183 {offsets = [0, 0], sizes = [2, 64], strides = [1, 1]} : vector<2x96xf32> to vector<2x64xf32>
    %188 = arith.addf %186, %187 : vector<2x64xf32>
    %189 = arith.negf %188 : vector<2x64xf32>
    %190 = math.exp %189 : vector<2x64xf32>
    %cst_32 = arith.constant 1.000000e+00 : f32
    %191 = vector.broadcast %cst_32 : f32 to vector<2x64xf32>
    %192 = arith.addf %191, %190 : vector<2x64xf32>
    %193 = arith.divf %191, %192 : vector<2x64xf32>
    %194 = vector.extract_strided_slice %193 {offsets = [0, 0], sizes = [2, 32], strides = [1, 1]} : vector<2x64xf32> to vector<2x32xf32>
    %195 = vector.extract_strided_slice %193 {offsets = [0, 32], sizes = [2, 32], strides = [1, 1]} : vector<2x64xf32> to vector<2x32xf32>
    %196 = vector.extract_strided_slice %185 {offsets = [0, 64], sizes = [2, 32], strides = [1, 1]} : vector<2x96xf32> to vector<2x32xf32>
    %197 = vector.extract_strided_slice %183 {offsets = [0, 64], sizes = [2, 32], strides = [1, 1]} : vector<2x96xf32> to vector<2x32xf32>
    %198 = vector.broadcast %12 : vector<1x32xf32> to vector<2x32xf32>
    %199 = arith.addf %197, %198 : vector<2x32xf32>
    %200 = arith.mulf %194, %199 : vector<2x32xf32>
    %201 = arith.addf %196, %200 : vector<2x32xf32>
    %202 = math.tanh %201 : vector<2x32xf32>
    %203 = arith.subf %181, %202 : vector<2x32xf32>
    %204 = arith.mulf %195, %203 : vector<2x32xf32>
    %205 = arith.addf %202, %204 : vector<2x32xf32>
    %206 = arith.truncf %205 : vector<2x32xf32> to vector<2x32xbf16>
    %c0_33 = arith.constant 0 : index
    %c0_34 = arith.constant 0 : index
    %207 = vector.load %arg6[%c0_33, %c0_34] : memref<32x4xbf16, #tpu.memory_space<vmem>>, vector<32x4xbf16>
    %cst_35 = arith.constant dense<0.000000e+00> : vector<2x4xf32>
    %208 = tpu.matmul %206, %207, %cst_35 {dimension_numbers = #tpu.dot_dimension_numbers<[1], [0], [0], [1], [0, 0, 1, 1], [], []>} : vector<2x32xbf16>, vector<32x4xbf16>, vector<2x4xf32> -> vector<2x4xf32>
    %209 = arith.addf %2, %208 : vector<2x4xf32>
    %c0_36 = arith.constant 0 : index
    %c0_37 = arith.constant 0 : index
    %210 = vector.load %arg8[%c0_36, %c0_37] : memref<1x4xf32, #tpu.memory_space<vmem>>, vector<1x4xf32>
    %211 = vector.broadcast %210 : vector<1x4xf32> to vector<2x4xf32>
    %212 = arith.addf %209, %211 : vector<2x4xf32>
    %c0_38 = arith.constant 0 : index
    %c0_39 = arith.constant 0 : index
    %213 = vector.load %arg9[%c0_38, %c0_39] : memref<2x4xf32, #tpu.memory_space<vmem>>, vector<2x4xf32>
    tpu.vector_store %arg9[%c0_38, %c0_39], %212 {strides = array<i32>} : memref<2x4xf32, #tpu.memory_space<vmem>>, vector<2x4xf32>,
    return
  }
}

</mosaic_0001>

<bundles_post_ra>
// kernel: tpu_custom_call.1
= control target key start
LH: loop header
LB: loop body
LE: loop exit
PB: predicated region body
PF: predicated region fallthrough
CT: control target
= control target key end

     0   :  { %v841_v3 = vmov 0   ;;  %s1032_s0 = inlined_call_operand.vmem [shape: bf16[2,16], index: 0, kind: input, shape index: {}]   ;;  %s1033_s1 = inlined_call_operand.vmem [shape: f32[8,2,1], index: 1, kind: input, shape index: {}]   ;;  %s1034_s2 = inlined_call_operand.vmem [shape: f32[1,1,96], index: 2, kind: input, shape index: {}]   ;;  %s1035_s3 = inlined_call_operand.vmem [shape: f32[1,1,96], index: 3, kind: input, shape index: {}]   ;;  %s1036_s4 = inlined_call_operand.vmem [shape: f32[1,32], index: 4, kind: input, shape index: {}]   ;;  %s1037_s5 = inlined_call_operand.vmem [shape: bf16[32,96], index: 5, kind: input, shape index: {}]   ;;  %s1038_s6 = inlined_call_operand.vmem [shape: bf16[32,4], index: 6, kind: input, shape index: {}]   ;;  %s1039_s7 = inlined_call_operand.vmem [shape: bf16[16,4], index: 7, kind: input, shape index: {}]   ;;  %s1040_s8 = inlined_call_operand.vmem [shape: f32[1,4], index: 8, kind: input, shape index: {}]   ;;  %s1041_s9 = inlined_call_operand.hbm [shape: f32[2,4], index: 9, kind: output, shape index: {}]  }
   0x1   :  { %v753_v0 = vld [vmem:[%s1037_s5 + $0x8] sm:$0xff]  ;;  %v752_v1 = vld [vmem:[%s1037_s5] sm:$0xff]  ;;  %761 = vset.pattern.permute.xlu0 %v841_v3  ;;  %762 = vset.pattern.permute.xlu2 %v841_v3 }
   0x2   :  { %v763_v2 = vld [vmem:[%s1036_s4] ss:$0 sm:$0xff]  ;;  %136 = vmatpush.bf16.msra.mxu0 %v753_v0  ;;  %204 = vmatpush.bf16.msra.mxu1 %v753_v0 }
   0x3   :  { %14 = vsyncpa [#allocation3], 0  ;;  %s842_s15 = smov 64   ;;  %267 = vmatpush.bf16.msra.mxu2 %v753_v0  ;;  %330 = vmatpush.bf16.msra.mxu3 %v753_v0  ;;  %v37_v4 = vld [vmem:[%s1033_s1] sm:$0x3]  ;;  %vm126_vm4 = vcmask 261120  }
   0x4   :  { %165 = vrot.lane.b32.xlu0 %v763_v2, %s842_s15  ;;  %v916_v9 = vld [vmem:[%s1034_s2] ss:$0 sm:$0xff]  ;;  %s843_s2 = smov 96   ;;  %v38_v39 = vld [vmem:[%s1033_s1 + $0x2] sm:$0x3]  ;;  %s705_s20 = sshll.u32 %s1041_s9, 4  ;;  %s706_s20 = int_to_ptr.hbm [resolvable:$true] %s705_s20 }
   0x5   :  { %v921_v11 = vld [vmem:[%s1035_s3] ss:$0 sm:$0xff]  ;;  %s844_s3 = smov 32  }
   0x6   :  { %137 = vmatpush.bf16.msra.mxu0 %v752_v1  ;;  %205 = vmatpush.bf16.msra.mxu1 %v752_v1 }
   0x7   :  { %268 = vmatpush.bf16.msra.mxu2 %v752_v1  ;;  %331 = vmatpush.bf16.msra.mxu3 %v752_v1 }
   0x9   :  { %138 = vmatmul.bf16.vlgmr.msra.gmra.mxu0 %v841_v3  ;;  %v39_v3 = vld [vmem:[%s1033_s1 + $0x4] sm:$0x3] }
   0xa   :  { %393 = vmatpush.bf16.msrb.mxu0 %v753_v0  ;;  %456 = vmatpush.bf16.msrb.mxu1 %v753_v0 }
   0xb   :  { %519 = vmatpush.bf16.msrb.mxu2 %v753_v0  ;;  %582 = vmatpush.bf16.msrb.mxu3 %v753_v0 }
   0xc   :  { %48 = vperm.xlu0 %761, %v37_v4  }
   0xe   :  { %394 = vmatpush.bf16.msrb.mxu0 %v752_v1  ;;  %457 = vmatpush.bf16.msrb.mxu1 %v752_v1 }
   0xf   :  { %520 = vmatpush.bf16.msrb.mxu2 %v752_v1  ;;  %583 = vmatpush.bf16.msrb.mxu3 %v752_v1 }
  0x76   :  { %v909_v5 = vpop.permute.xlu0 %165 }
  0x7e   :  { %v49_v10 = vpop.permute.xlu0 %48 }
  0x7f   :  { %v89_v12 = vmul.f32 %v916_v9, %v49_v10 }
  0x81   :  { %v101_v13 = vadd.f32 %v921_v11, %v89_v12 }
  0x86   :  { %v139_v6 = vpop.f32.mrf.mxu0 }
  0x87   :  { %v168_v7 = vadd.f32 %v909_v5, %v139_v6  ;;  %v143_v14 = vadd.f32 %v139_v6, %v101_v13 }
  0x89   :  { %170 = vrot.lane.b32.xlu1 %v168_v7, %s842_s15  ;;  %v722_v15 = vmul.f32 -1.442695, %v143_v14 }
  0x8b   :  { %767 = vpow2.f32 %v722_v15 }
  0x8e   :  { %v141_v8 = vpop.f32.mrf.mxu0 }
  0x91   :  { %v768_v16 = vpop.eup %767 }
  0x92   :  { %v147_v17 = vadd.f32 1.0, %v768_v16 }
  0x94   :  { %769 = vrcp.f32 %v147_v17  ;;  %v159_v23 = vand.u32 2147483648, %v147_v17  ;;  %vm153_vm1 = vweird.f32 %v147_v17  ;;  %v157_v24 = vand.u32 2147483647, %v147_v17 }
  0x96   :  { %v160_v26 = vor.u32 1.1754944e-38, %v159_v23  ;;  %vm158_vm3 = vcmp.eq.f32.partialorder %v157_v24, 8.507059e+37 }
  0x9a   :  { %v770_v18 = vpop.eup %769 }
  0x9b   :  { %v149_v19 = vmul.f32 %v770_v18, %v147_v17  ;;  %vm154_vm0 = vweird.f32 %v770_v18 }
  0x9c   :  { %vm155_vm2 = vmor %vm153_vm1, %vm154_vm0 }
  0x9d   :  { %v150_v20 = vsub.f32 1.0, %v149_v19 }
  0x9f   :  { %v151_v21 = vmul.f32 %v770_v18, %v150_v20 }
  0xa1   :  { %v152_v22 = vadd.f32 %v770_v18, %v151_v21 }
  0xa3   :  { %v156_v25 = vsel %vm155_vm2, %v770_v18, %v152_v22 }
  0xa4   :  { %v161_v28 = vsel %vm158_vm3, %v160_v26, %v156_v25 }
  0xfb   :  { %v171_v27 = vpop.permute.xlu1 %170 }
  0xfc   :  { %v173_v29 = vmul.f32 %v171_v27, %v161_v28 }
  0xfe   :  { %175 = vrot.lane.b32.xlu1 %v173_v29, %s842_s15 }
 0x170   :  { %v176_v30 = vpop.permute.xlu1 %175 }
 0x171   :  { %v178_v31 = vadd.f32 %v176_v30, %v101_v13 }
 0x173   :  { %771 = vtanh.f32 %v178_v31 }
 0x179   :  { %v772_v32 = vpop.eup %771 }
 0x17a   :  { %v180_v33 = vsub.f32 0.0, %v772_v32 }
 0x17c   :  { %182 = vrot.lane.b32.xlu2 %v180_v33, %s843_s2 }
 0x1d6   :  { %v183_v34 = vpop.permute.xlu2 %182 }
 0x1d7   :  { %v185_v35 = vmul.f32 %v183_v34, %v161_v28 }
 0x1d9   :  { %187 = vrot.lane.b32.xlu2 %v185_v35, %s844_s3 }
 0x1e1   :  { %53 = vperm.xlu2 %762, %v38_v39   ;;  %v40_v39 = vld [vmem:[%s1033_s1 + $0x6] sm:$0x3] }
 0x233   :  { %v188_v36 = vpop.permute.xlu2 %187 }
 0x234   :  { %v190_v37 = vadd.f32 %v772_v32, %v188_v36 }
 0x236   :  { %v191_v38 = vpack.c.bf16 %v190_v37, %v190_v37 }
 0x238   :  { %193 = vrot.lane.b32.xlu1 %v191_v38, %s842_s15 }
 0x23b   :  { %v54_v44 = vpop.permute.xlu2 %53 }
 0x23c   :  { %v90_v45 = vmul.f32 %v916_v9, %v54_v44 }
 0x23e   :  { %v102_v46 = vadd.f32 %v921_v11, %v90_v45 }
 0x2aa   :  { %v194_v40 = vpop.permute.xlu1 %193 }
 0x2ab   :  { %723 = vmatmul.msk.bf16.vlgmr.msra.gmra.mxu1 %vm126_vm4, %v194_v40 }
 0x328   :  { %v207_v41 = vpop.f32.mrf.mxu1 }
 0x329   :  { %v231_v42 = vadd.f32 %v207_v41, %v909_v5  ;;  %v211_v47 = vadd.f32 %v207_v41, %v102_v46 }
 0x32b   :  { %233 = vrot.lane.b32.xlu0 %v231_v42, %s842_s15  ;;  %v724_v48 = vmul.f32 -1.442695, %v211_v47 }
 0x32d   :  { %773 = vpow2.f32 %v724_v48 }
 0x330   :  { %v209_v43 = vpop.f32.mrf.mxu1 }
 0x333   :  { %v774_v49 = vpop.eup %773 }
 0x334   :  { %v215_v50 = vadd.f32 1.0, %v774_v49 }
 0x336   :  { %775 = vrcp.f32 %v215_v50  ;;  %v227_v56 = vand.u32 2147483648, %v215_v50  ;;  %vm221_vm6 = vweird.f32 %v215_v50  ;;  %v225_v57 = vand.u32 2147483647, %v215_v50 }
 0x338   :  { %v228_v59 = vor.u32 1.1754944e-38, %v227_v56  ;;  %vm226_vm8 = vcmp.eq.f32.partialorder %v225_v57, 8.507059e+37 }
 0x33c   :  { %v776_v51 = vpop.eup %775 }
 0x33d   :  { %v217_v52 = vmul.f32 %v776_v51, %v215_v50  ;;  %vm222_vm5 = vweird.f32 %v776_v51 }
 0x33e   :  { %vm223_vm7 = vmor %vm221_vm6, %vm222_vm5 }
 0x33f   :  { %v218_v53 = vsub.f32 1.0, %v217_v52 }
 0x341   :  { %v219_v54 = vmul.f32 %v776_v51, %v218_v53 }
 0x343   :  { %v220_v55 = vadd.f32 %v776_v51, %v219_v54 }
 0x345   :  { %v224_v58 = vsel %vm223_vm7, %v776_v51, %v220_v55 }
 0x346   :  { %v229_v61 = vsel %vm226_vm8, %v228_v59, %v224_v58 }
 0x39d   :  { %v234_v60 = vpop.permute.xlu0 %233 }
 0x39e   :  { %v236_v62 = vmul.f32 %v234_v60, %v229_v61 }
 0x3a0   :  { %238 = vrot.lane.b32.xlu1 %v236_v62, %s842_s15 }
 0x412   :  { %v239_v63 = vpop.permute.xlu1 %238 }
 0x413   :  { %v241_v0 = vadd.f32 %v239_v63, %v102_v46 }
 0x415   :  { %777 = vtanh.f32 %v241_v0 }
 0x41b   :  { %v778_v1 = vpop.eup %777 }
 0x41c   :  { %v243_v2 = vsub.f32 %v190_v37, %v778_v1 }
 0x41e   :  { %245 = vrot.lane.b32.xlu2 %v243_v2, %s843_s2 }
 0x426   :  { %58 = vperm.xlu2 %762, %v39_v3  }
 0x478   :  { %v246_v4 = vpop.permute.xlu2 %245 }
 0x479   :  { %v248_v6 = vmul.f32 %v246_v4, %v229_v61 }
 0x47b   :  { %250 = vrot.lane.b32.xlu0 %v248_v6, %s844_s3 }
 0x480   :  { %v59_v16 = vpop.permute.xlu2 %58 }
 0x481   :  { %v91_v17 = vmul.f32 %v916_v9, %v59_v16 }
 0x483   :  { %v103_v18 = vadd.f32 %v921_v11, %v91_v17 }
 0x4ed   :  { %v251_v7 = vpop.permute.xlu0 %250 }
 0x4ee   :  { %v253_v8 = vadd.f32 %v778_v1, %v251_v7 }
 0x4f0   :  { %v254_v10 = vpack.c.bf16 %v253_v8, %v253_v8 }
 0x4f2   :  { %256 = vrot.lane.b32.xlu1 %v254_v10, %s842_s15  ;;  %v41_v10 = vld [vmem:[%s1033_s1 + $0x8] sm:$0x3] }
 0x564   :  { %v257_v12 = vpop.permute.xlu1 %256 }
 0x565   :  { %725 = vmatmul.msk.bf16.vlgmr.msra.gmra.mxu2 %vm126_vm4, %v257_v12 }
 0x5e8   :  { %v270_v13 = vpop.f32.mrf.mxu2 }
 0x5e9   :  { %v294_v14 = vadd.f32 %v270_v13, %v909_v5  ;;  %v274_v19 = vadd.f32 %v270_v13, %v103_v18 }
 0x5eb   :  { %296 = vrot.lane.b32.xlu0 %v294_v14, %s842_s15  ;;  %v726_v20 = vmul.f32 -1.442695, %v274_v19 }
 0x5ed   :  { %779 = vpow2.f32 %v726_v20 }
 0x5f0   :  { %v272_v15 = vpop.f32.mrf.mxu2 }
 0x5f3   :  { %v780_v21 = vpop.eup %779 }
 0x5f4   :  { %v278_v22 = vadd.f32 1.0, %v780_v21 }
 0x5f6   :  { %781 = vrcp.f32 %v278_v22  ;;  %v290_v28 = vand.u32 2147483648, %v278_v22  ;;  %vm284_vm10 = vweird.f32 %v278_v22  ;;  %v288_v29 = vand.u32 2147483647, %v278_v22 }
 0x5f8   :  { %v291_v31 = vor.u32 1.1754944e-38, %v290_v28  ;;  %vm289_vm12 = vcmp.eq.f32.partialorder %v288_v29, 8.507059e+37 }
 0x5fc   :  { %v782_v23 = vpop.eup %781 }
 0x5fd   :  { %v280_v24 = vmul.f32 %v782_v23, %v278_v22  ;;  %vm285_vm9 = vweird.f32 %v782_v23 }
 0x5fe   :  { %vm286_vm11 = vmor %vm284_vm10, %vm285_vm9 }
 0x5ff   :  { %v281_v25 = vsub.f32 1.0, %v280_v24 }
 0x601   :  { %v282_v26 = vmul.f32 %v782_v23, %v281_v25 }
 0x603   :  { %v283_v27 = vadd.f32 %v782_v23, %v282_v26 }
 0x605   :  { %v287_v30 = vsel %vm286_vm11, %v782_v23, %v283_v27 }
 0x606   :  { %v292_v33 = vsel %vm289_vm12, %v291_v31, %v287_v30 }
 0x65d   :  { %v297_v32 = vpop.permute.xlu0 %296 }
 0x65e   :  { %v299_v34 = vmul.f32 %v297_v32, %v292_v33 }
 0x660   :  { %301 = vrot.lane.b32.xlu1 %v299_v34, %s842_s15 }
 0x6d2   :  { %v302_v35 = vpop.permute.xlu1 %301 }
 0x6d3   :  { %v304_v36 = vadd.f32 %v302_v35, %v103_v18 }
 0x6d5   :  { %783 = vtanh.f32 %v304_v36 }
 0x6db   :  { %v784_v37 = vpop.eup %783 }
 0x6dc   :  { %v306_v38 = vsub.f32 %v253_v8, %v784_v37 }
 0x6de   :  { %308 = vrot.lane.b32.xlu2 %v306_v38, %s843_s2 }
 0x6e6   :  { %63 = vperm.xlu2 %762, %v40_v39  }
 0x738   :  { %v309_v40 = vpop.permute.xlu2 %308 }
 0x739   :  { %v311_v41 = vmul.f32 %v309_v40, %v292_v33 }
 0x73b   :  { %313 = vrot.lane.b32.xlu0 %v311_v41, %s844_s3 }
 0x740   :  { %v64_v49 = vpop.permute.xlu2 %63 }
 0x741   :  { %v92_v50 = vmul.f32 %v916_v9, %v64_v49 }
 0x743   :  { %v104_v51 = vadd.f32 %v921_v11, %v92_v50 }
 0x7ad   :  { %v314_v42 = vpop.permute.xlu0 %313 }
 0x7ae   :  { %v316_v43 = vadd.f32 %v784_v37, %v314_v42 }
 0x7b0   :  { %v317_v44 = vpack.c.bf16 %v316_v43, %v316_v43 }
 0x7b2   :  { %319 = vrot.lane.b32.xlu1 %v317_v44, %s842_s15  ;;  %v42_v44 = vld [vmem:[%s1033_s1 + $0xa] sm:$0x3] }
 0x824   :  { %v320_v45 = vpop.permute.xlu1 %319 }
 0x825   :  { %727 = vmatmul.msk.bf16.vlgmr.msra.gmra.mxu3 %vm126_vm4, %v320_v45 }
 0x8a8   :  { %v333_v46 = vpop.f32.mrf.mxu3 }
 0x8a9   :  { %v357_v47 = vadd.f32 %v333_v46, %v909_v5  ;;  %v337_v52 = vadd.f32 %v333_v46, %v104_v51 }
 0x8ab   :  { %359 = vrot.lane.b32.xlu0 %v357_v47, %s842_s15  ;;  %v728_v53 = vmul.f32 -1.442695, %v337_v52 }
 0x8ad   :  { %785 = vpow2.f32 %v728_v53 }
 0x8b0   :  { %v335_v48 = vpop.f32.mrf.mxu3 }
 0x8b3   :  { %v786_v54 = vpop.eup %785 }
 0x8b4   :  { %v341_v55 = vadd.f32 1.0, %v786_v54 }
 0x8b6   :  { %787 = vrcp.f32 %v341_v55  ;;  %v353_v61 = vand.u32 2147483648, %v341_v55  ;;  %vm347_vm14 = vweird.f32 %v341_v55  ;;  %v351_v62 = vand.u32 2147483647, %v341_v55 }
 0x8b8   :  { %v354_v0 = vor.u32 1.1754944e-38, %v353_v61  ;;  %vm352_vm0 = vcmp.eq.f32.partialorder %v351_v62, 8.507059e+37 }
 0x8bc   :  { %v788_v56 = vpop.eup %787 }
 0x8bd   :  { %v343_v57 = vmul.f32 %v788_v56, %v341_v55  ;;  %vm348_vm13 = vweird.f32 %v788_v56 }
 0x8be   :  { %vm349_vm15 = vmor %vm347_vm14, %vm348_vm13 }
 0x8bf   :  { %v344_v58 = vsub.f32 1.0, %v343_v57 }
 0x8c1   :  { %v345_v59 = vmul.f32 %v788_v56, %v344_v58 }
 0x8c3   :  { %v346_v60 = vadd.f32 %v788_v56, %v345_v59 }
 0x8c5   :  { %v350_v63 = vsel %vm349_vm15, %v788_v56, %v346_v60 }
 0x8c6   :  { %v355_v2 = vsel %vm352_vm0, %v354_v0, %v350_v63 }
 0x91d   :  { %v360_v1 = vpop.permute.xlu0 %359 }
 0x91e   :  { %v362_v3 = vmul.f32 %v360_v1, %v355_v2 }
 0x920   :  { %364 = vrot.lane.b32.xlu1 %v362_v3, %s842_s15 }
 0x992   :  { %v365_v4 = vpop.permute.xlu1 %364 }
 0x993   :  { %v367_v6 = vadd.f32 %v365_v4, %v104_v51 }
 0x995   :  { %789 = vtanh.f32 %v367_v6 }
 0x99b   :  { %v790_v7 = vpop.eup %789 }
 0x99c   :  { %v369_v8 = vsub.f32 %v316_v43, %v790_v7 }
 0x99e   :  { %371 = vrot.lane.b32.xlu2 %v369_v8, %s843_s2 }
 0x9a6   :  { %68 = vperm.xlu2 %762, %v41_v10  }
 0x9f8   :  { %v372_v12 = vpop.permute.xlu2 %371 }
 0x9f9   :  { %v374_v13 = vmul.f32 %v372_v12, %v355_v2 }
 0x9fb   :  { %376 = vrot.lane.b32.xlu0 %v374_v13, %s844_s3 }
 0xa00   :  { %v69_v21 = vpop.permute.xlu2 %68 }
 0xa01   :  { %v93_v22 = vmul.f32 %v916_v9, %v69_v21 }
 0xa03   :  { %v105_v23 = vadd.f32 %v921_v11, %v93_v22 }
 0xa6d   :  { %v377_v14 = vpop.permute.xlu0 %376 }
 0xa6e   :  { %v379_v15 = vadd.f32 %v790_v7, %v377_v14 }
 0xa70   :  { %v380_v16 = vpack.c.bf16 %v379_v15, %v379_v15 }
 0xa72   :  { %382 = vrot.lane.b32.xlu1 %v380_v16, %s842_s15  ;;  %v43_v16 = vld [vmem:[%s1033_s1 + $0xc] sm:$0x3] }
 0xae4   :  { %v383_v17 = vpop.permute.xlu1 %382 }
 0xae5   :  { %729 = vmatmul.msk.bf16.vlgmr.msrb.gmra.mxu0 %vm126_vm4, %v383_v17 }
 0xb62   :  { %v396_v18 = vpop.f32.mrf.mxu0 }
 0xb63   :  { %v420_v19 = vadd.f32 %v396_v18, %v909_v5  ;;  %v400_v24 = vadd.f32 %v396_v18, %v105_v23 }
 0xb65   :  { %422 = vrot.lane.b32.xlu0 %v420_v19, %s842_s15  ;;  %v730_v25 = vmul.f32 -1.442695, %v400_v24 }
 0xb67   :  { %791 = vpow2.f32 %v730_v25 }
 0xb6a   :  { %v398_v20 = vpop.f32.mrf.mxu0 }
 0xb6d   :  { %v792_v26 = vpop.eup %791 }
 0xb6e   :  { %v404_v27 = vadd.f32 1.0, %v792_v26 }
 0xb70   :  { %793 = vrcp.f32 %v404_v27  ;;  %v416_v33 = vand.u32 2147483648, %v404_v27  ;;  %vm410_vm2 = vweird.f32 %v404_v27  ;;  %v414_v34 = vand.u32 2147483647, %v404_v27 }
 0xb72   :  { %v417_v36 = vor.u32 1.1754944e-38, %v416_v33  ;;  %vm415_vm5 = vcmp.eq.f32.partialorder %v414_v34, 8.507059e+37 }
 0xb76   :  { %v794_v28 = vpop.eup %793 }
 0xb77   :  { %v406_v29 = vmul.f32 %v794_v28, %v404_v27  ;;  %vm411_vm1 = vweird.f32 %v794_v28 }
 0xb78   :  { %vm412_vm3 = vmor %vm410_vm2, %vm411_vm1  ;;  %vm674_vm2 = vcmask 130048  }
 0xb79   :  { %v407_v30 = vsub.f32 1.0, %v406_v29 }
 0xb7b   :  { %v408_v31 = vmul.f32 %v794_v28, %v407_v30 }
 0xb7d   :  { %v409_v32 = vadd.f32 %v794_v28, %v408_v31 }
 0xb7f   :  { %v413_v35 = vsel %vm412_vm3, %v794_v28, %v409_v32  ;;  %vm696_vm3 = vcmask 25600  }
 0xb80   :  { %v418_v38 = vsel %vm415_vm5, %v417_v36, %v413_v35 }
 0xbd7   :  { %v423_v37 = vpop.permute.xlu0 %422 }
 0xbd8   :  { %v425_v39 = vmul.f32 %v423_v37, %v418_v38 }
 0xbda   :  { %427 = vrot.lane.b32.xlu1 %v425_v39, %s842_s15 }
 0xc4c   :  { %v428_v40 = vpop.permute.xlu1 %427 }
 0xc4d   :  { %v430_v41 = vadd.f32 %v428_v40, %v105_v23 }
 0xc4f   :  { %795 = vtanh.f32 %v430_v41 }
 0xc55   :  { %v796_v42 = vpop.eup %795 }
 0xc56   :  { %v432_v43 = vsub.f32 %v379_v15, %v796_v42 }
 0xc58   :  { %434 = vrot.lane.b32.xlu2 %v432_v43, %s843_s2 }
 0xc60   :  { %73 = vperm.xlu2 %762, %v42_v44  }
 0xcb2   :  { %v435_v45 = vpop.permute.xlu2 %434 }
 0xcb3   :  { %v437_v46 = vmul.f32 %v435_v45, %v418_v38 }
 0xcb5   :  { %439 = vrot.lane.b32.xlu0 %v437_v46, %s844_s3 }
 0xcba   :  { %v74_v54 = vpop.permute.xlu2 %73 }
 0xcbb   :  { %v94_v55 = vmul.f32 %v916_v9, %v74_v54 }
 0xcbd   :  { %v106_v56 = vadd.f32 %v921_v11, %v94_v55 }
 0xd27   :  { %v440_v47 = vpop.permute.xlu0 %439 }
 0xd28   :  { %v442_v48 = vadd.f32 %v796_v42, %v440_v47 }
 0xd2a   :  { %v443_v49 = vpack.c.bf16 %v442_v48, %v442_v48 }
 0xd2c   :  { %445 = vrot.lane.b32.xlu1 %v443_v49, %s842_s15  ;;  %v44_v49 = vld [vmem:[%s1033_s1 + $0xe] sm:$0x3] }
 0xd9e   :  { %v446_v50 = vpop.permute.xlu1 %445 }
 0xd9f   :  { %731 = vmatmul.msk.bf16.vlgmr.msrb.gmra.mxu1 %vm126_vm4, %v446_v50 }
 0xe1c   :  { %v459_v51 = vpop.f32.mrf.mxu1 }
 0xe1d   :  { %v483_v52 = vadd.f32 %v459_v51, %v909_v5  ;;  %v463_v57 = vadd.f32 %v459_v51, %v106_v56 }
 0xe1f   :  { %485 = vrot.lane.b32.xlu0 %v483_v52, %s842_s15  ;;  %v732_v58 = vmul.f32 -1.442695, %v463_v57 }
 0xe21   :  { %797 = vpow2.f32 %v732_v58 }
 0xe24   :  { %v461_v53 = vpop.f32.mrf.mxu1 }
 0xe27   :  { %v798_v59 = vpop.eup %797 }
 0xe28   :  { %v467_v60 = vadd.f32 1.0, %v798_v59 }
 0xe2a   :  { %799 = vrcp.f32 %v467_v60  ;;  %v479_v2 = vand.u32 2147483648, %v467_v60  ;;  %vm473_vm7 = vweird.f32 %v467_v60  ;;  %v477_v3 = vand.u32 2147483647, %v467_v60 }
 0xe2c   :  { %v480_v6 = vor.u32 1.1754944e-38, %v479_v2  ;;  %vm478_vm9 = vcmp.eq.f32.partialorder %v477_v3, 8.507059e+37 }
 0xe30   :  { %v800_v61 = vpop.eup %799 }
 0xe31   :  { %v469_v62 = vmul.f32 %v800_v61, %v467_v60  ;;  %vm474_vm6 = vweird.f32 %v800_v61 }
 0xe32   :  { %vm475_vm8 = vmor %vm473_vm7, %vm474_vm6 }
 0xe33   :  { %v470_v63 = vsub.f32 1.0, %v469_v62 }
 0xe35   :  { %v471_v0 = vmul.f32 %v800_v61, %v470_v63 }
 0xe37   :  { %v472_v1 = vadd.f32 %v800_v61, %v471_v0 }
 0xe39   :  { %v476_v4 = vsel %vm475_vm8, %v800_v61, %v472_v1 }
 0xe3a   :  { %v481_v8 = vsel %vm478_vm9, %v480_v6, %v476_v4 }
 0xe91   :  { %v486_v7 = vpop.permute.xlu0 %485 }
 0xe92   :  { %v488_v10 = vmul.f32 %v486_v7, %v481_v8 }
 0xe94   :  { %490 = vrot.lane.b32.xlu1 %v488_v10, %s842_s15 }
 0xf06   :  { %v491_v12 = vpop.permute.xlu1 %490 }
 0xf07   :  { %v493_v13 = vadd.f32 %v491_v12, %v106_v56 }
 0xf09   :  { %801 = vtanh.f32 %v493_v13 }
 0xf0f   :  { %v802_v14 = vpop.eup %801 }
 0xf10   :  { %v495_v15 = vsub.f32 %v442_v48, %v802_v14 }
 0xf12   :  { %497 = vrot.lane.b32.xlu2 %v495_v15, %s843_s2 }
 0xf1a   :  { %78 = vperm.xlu2 %762, %v43_v16  }
 0xf6c   :  { %v498_v17 = vpop.permute.xlu2 %497 }
 0xf6d   :  { %v500_v18 = vmul.f32 %v498_v17, %v481_v8 }
 0xf6f   :  { %502 = vrot.lane.b32.xlu0 %v500_v18, %s844_s3 }
 0xf74   :  { %v79_v26 = vpop.permute.xlu2 %78 }
 0xf75   :  { %v95_v27 = vmul.f32 %v916_v9, %v79_v26 }
 0xf77   :  { %v107_v28 = vadd.f32 %v921_v11, %v95_v27 }
 0xfe1   :  { %v503_v19 = vpop.permute.xlu0 %502 }
 0xfe2   :  { %v505_v20 = vadd.f32 %v802_v14, %v503_v19 }
 0xfe4   :  { %v506_v21 = vpack.c.bf16 %v505_v20, %v505_v20 }
 0xfe6   :  { %508 = vrot.lane.b32.xlu1 %v506_v21, %s842_s15  ;;  %v751_v21 = vld [vmem:[%s1039_s7] sm:$0xff] }
 0xfe7   :  { %685 = vmatpush.bf16.msra.mxu1 %v751_v21 }
0x1058   :  { %v509_v22 = vpop.permute.xlu1 %508 }
0x1059   :  { %733 = vmatmul.msk.bf16.vlgmr.msrb.gmra.mxu2 %vm126_vm4, %v509_v22  ;;  %v754_v22 = vld [vmem:[%s1038_s6] sm:$0xff] }
0x10dc   :  { %v522_v23 = vpop.f32.mrf.mxu2 }
0x10dd   :  { %v546_v24 = vadd.f32 %v522_v23, %v909_v5  ;;  %v526_v29 = vadd.f32 %v522_v23, %v107_v28  ;;  %v34_v23 = vld [vmem:[%s1032_s0] sm:$0x1] }
0x10de   :  { %750 = vmatmul.msk.bf16.vlgmr.msra.gmra.mxu1 %vm674_vm2, %v34_v23 }
0x10df   :  { %548 = vrot.lane.b32.xlu0 %v546_v24, %s842_s15  ;;  %v734_v30 = vmul.f32 -1.442695, %v526_v29 }
0x10e1   :  { %803 = vpow2.f32 %v734_v30  ;;  %v766_v30 = vld [vmem:[%s1040_s8] ss:$0 sm:$0xff] }
0x10e4   :  { %v524_v25 = vpop.f32.mrf.mxu2 }
0x10e7   :  { %v804_v31 = vpop.eup %803 }
0x10e8   :  { %v530_v32 = vadd.f32 1.0, %v804_v31 }
0x10ea   :  { %805 = vrcp.f32 %v530_v32  ;;  %v542_v38 = vand.u32 2147483648, %v530_v32  ;;  %vm536_vm11 = vweird.f32 %v530_v32  ;;  %v540_v39 = vand.u32 2147483647, %v530_v32 }
0x10ec   :  { %v543_v41 = vor.u32 1.1754944e-38, %v542_v38  ;;  %vm541_vm13 = vcmp.eq.f32.partialorder %v540_v39, 8.507059e+37 }
0x10f0   :  { %v806_v33 = vpop.eup %805 }
0x10f1   :  { %v532_v34 = vmul.f32 %v806_v33, %v530_v32  ;;  %vm537_vm10 = vweird.f32 %v806_v33 }
0x10f2   :  { %vm538_vm12 = vmor %vm536_vm11, %vm537_vm10 }
0x10f3   :  { %v533_v35 = vsub.f32 1.0, %v532_v34 }
0x10f5   :  { %v534_v36 = vmul.f32 %v806_v33, %v533_v35 }
0x10f7   :  { %v535_v37 = vadd.f32 %v806_v33, %v534_v36 }
0x10f9   :  { %v539_v40 = vsel %vm538_vm12, %v806_v33, %v535_v37 }
0x10fa   :  { %v544_v43 = vsel %vm541_vm13, %v543_v41, %v539_v40 }
0x1151   :  { %v549_v42 = vpop.permute.xlu0 %548 }
0x1152   :  { %v551_v44 = vmul.f32 %v549_v42, %v544_v43 }
0x1154   :  { %553 = vrot.lane.b32.xlu1 %v551_v44, %s842_s15 }
0x115b   :  { %v687_v27 = vpop.f32.mrf.mxu1 }
0x11c6   :  { %v554_v45 = vpop.permute.xlu1 %553 }
0x11c7   :  { %v556_v46 = vadd.f32 %v554_v45, %v107_v28  ;;  %v689_v28 = vpop.f32.mrf.mxu1 }
0x11c9   :  { %807 = vtanh.f32 %v556_v46 }
0x11cf   :  { %v808_v47 = vpop.eup %807 }
0x11d0   :  { %v558_v48 = vsub.f32 %v505_v20, %v808_v47  ;;  %v755_v20 = vld [vmem:[%s1038_s6 + $0x8] sm:$0xff]  ;;  %s845_s6 = smov [#allocation2]  }
0x11d1   :  { %661 = vmatpush.bf16.msra.mxu0 %v755_v20  ;;  %s703_s0 = sshll.u32 %s845_s6, 4  ;;  %s704_s0 = int_to_ptr.vmem [resolvable:$true] %s703_s0 }
0x11d2   :  { %560 = vrot.lane.b32.xlu2 %v558_v48, %s843_s2 }
0x11d5   :  { %662 = vmatpush.bf16.msra.mxu0 %v754_v22 }
0x11da   :  { %83 = vperm.xlu2 %762, %v44_v49  }
0x122c   :  { %v561_v50 = vpop.permute.xlu2 %560 }
0x122d   :  { %v563_v51 = vmul.f32 %v561_v50, %v544_v43 }
0x122f   :  { %565 = vrot.lane.b32.xlu0 %v563_v51, %s844_s3 }
0x1234   :  { %v84_v59 = vpop.permute.xlu2 %83 }
0x1235   :  { %v96_v60 = vmul.f32 %v916_v9, %v84_v59 }
0x1237   :  { %v108_v61 = vadd.f32 %v921_v11, %v96_v60 }
0x12a1   :  { %v566_v52 = vpop.permute.xlu0 %565 }
0x12a2   :  { %v568_v53 = vadd.f32 %v808_v47, %v566_v52 }
0x12a4   :  { %v569_v54 = vpack.c.bf16 %v568_v53, %v568_v53 }
0x12a6   :  { %571 = vrot.lane.b32.xlu1 %v569_v54, %s842_s15 }
0x1318   :  { %v572_v55 = vpop.permute.xlu1 %571 }
0x1319   :  { %735 = vmatmul.msk.bf16.vlgmr.msrb.gmra.mxu3 %vm126_vm4, %v572_v55 }
0x139c   :  { %v585_v56 = vpop.f32.mrf.mxu3 }
0x139d   :  { %v609_v57 = vadd.f32 %v585_v56, %v909_v5  ;;  %v589_v62 = vadd.f32 %v585_v56, %v108_v61 }
0x139f   :  { %611 = vrot.lane.b32.xlu0 %v609_v57, %s842_s15  ;;  %v736_v63 = vmul.f32 -1.442695, %v589_v62 }
0x13a1   :  { %809 = vpow2.f32 %v736_v63 }
0x13a4   :  { %v587_v58 = vpop.f32.mrf.mxu3 }
0x13a7   :  { %v810_v0 = vpop.eup %809 }
0x13a8   :  { %v593_v1 = vadd.f32 1.0, %v810_v0 }
0x13aa   :  { %811 = vrcp.f32 %v593_v1  ;;  %v605_v5 = vand.u32 2147483648, %v593_v1  ;;  %vm599_vm15 = vweird.f32 %v593_v1  ;;  %v603_v8 = vand.u32 2147483647, %v593_v1 }
0x13ac   :  { %v606_v9 = vor.u32 1.1754944e-38, %v605_v5  ;;  %vm604_vm1 = vcmp.eq.f32.partialorder %v603_v8, 8.507059e+37 }
0x13b0   :  { %v812_v2 = vpop.eup %811 }
0x13b1   :  { %v595_v3 = vmul.f32 %v812_v2, %v593_v1  ;;  %vm600_vm14 = vweird.f32 %v812_v2 }
0x13b2   :  { %vm601_vm0 = vmor %vm599_vm15, %vm600_vm14 }
0x13b3   :  { %v596_v4 = vsub.f32 1.0, %v595_v3 }
0x13b5   :  { %v597_v6 = vmul.f32 %v812_v2, %v596_v4 }
0x13b7   :  { %v598_v7 = vadd.f32 %v812_v2, %v597_v6 }
0x13b9   :  { %v602_v10 = vsel %vm601_vm0, %v812_v2, %v598_v7 }
0x13ba   :  { %v607_v12 = vsel %vm604_vm1, %v606_v9, %v602_v10 }
0x1411   :  { %v612_v11 = vpop.permute.xlu0 %611 }
0x1412   :  { %v614_v13 = vmul.f32 %v612_v11, %v607_v12 }
0x1414   :  { %616 = vrot.lane.b32.xlu1 %v614_v13, %s842_s15 }
0x1486   :  { %v617_v14 = vpop.permute.xlu1 %616 }
0x1487   :  { %v619_v15 = vadd.f32 %v617_v14, %v108_v61 }
0x1489   :  { %813 = vtanh.f32 %v619_v15 }
0x148f   :  { %v814_v16 = vpop.eup %813 }
0x1490   :  { %v621_v17 = vsub.f32 %v568_v53, %v814_v16 }
0x1492   :  { %623 = vrot.lane.b32.xlu2 %v621_v17, %s843_s2 }
0x14ec   :  { %v624_v18 = vpop.permute.xlu2 %623 }
0x14ed   :  { %v626_v19 = vmul.f32 %v624_v18, %v607_v12 }
0x14ef   :  { %628 = vrot.lane.b32.xlu0 %v626_v19, %s844_s3 }
0x1561   :  { %v629_v24 = vpop.permute.xlu0 %628 }
0x1562   :  { %v631_v25 = vadd.f32 %v814_v16, %v629_v24 }
0x1564   :  { %v632_v26 = vpack.c.bf16 %v631_v25, %v631_v25 }
0x1566   :  { %638 = vrot.lane.b32.xlu1 %v632_v26, %s842_s15 }
0x15d8   :  { %v639_v29 = vpop.permute.xlu1 %638 }
0x15d9   :  { %745 = vmatmul.msk.bf16.vlgmr.msra.gmra.mxu0 %vm126_vm4, %v639_v29 }
0x1656   :  { %v664_v31 = vpop.f32.mrf.mxu0 }
0x1657   :  { %v688_v32 = vadd.f32 %v687_v27, %v664_v31 }
0x1659   :  { %v695_v33 = vadd.f32 %v766_v30, %v688_v32 }
0x165b   :  { %697 = vst.msk [vmem:[#allocation2] sm:$0x3] %vm696_vm3, %v695_v33 }
0x165c   :  { %708 = dma.vmem_to_hbm [thread:$0]  %s704_s0, 32, %s706_s20, [#allocation3]  }
0x165e   :  { %v666_v34 = vpop.f32.mrf.mxu0 }
0x165f   :  { %839 = dma.done.wait [#allocation3], 32  }
0x1660   :  { %840 = vsyncadd [#allocation3], 4294967264 }
0x1661   :  { %713 = vsyncpa [#allocation3], 1 }

</bundles_post_ra>
